<compile_context>
chip_gen: v6e
topology: v6e:2x2x1
jax: 0.10.0
libtpu: 0.0.40
codegen_flags: <defaults>
</compile_context>

<pallas_src>
import jax
import jax.numpy as jnp
from jax import lax
from jax.experimental import pallas as pl
from jax.experimental.pallas import tpu as pltpu


def _round_up(a, b):
    return -(-a // b) * b


def _cdiv(a, b):
    return -(-a // b)


def _make_causal_kernel(k, dilation, padding, pad_al, tile, compute_dtype):
    """kernel_size > 1: dilated causal conv with a carried context window."""
    f32 = jnp.float32
    base = pad_al - padding          # start of the causal context inside the window

    def kernel(padcol_ref, x_ref, w_ref, b_ref, o_ref, win_ref):
        # padcol_ref: (C, 1)            zeros for x1 channels, hid for z1 channels
        # x_ref:      (C, tile)         current time tile (input dtype, e.g. f32)
        # w_ref:      (k, n_out_t, C)   per-tap fused weights (compute dtype)
        # b_ref:      (n_out_t, 1)      bias2 (f32)
        # o_ref:      (n_out_t, tile)   output tile
        # win_ref:    (C, pad_al+tile)  persistent staging window; lanes
        #                               [base, pad_al) = causal context,
        #                               lanes [pad_al, pad_al+tile) = tile.
        t = pl.program_id(1)
        no = pl.program_id(2)
        c = win_ref.shape[0]

        @pl.when(no == 0)
        def _stage():                               # once per (batch, time tile)
            win_ref[:, pad_al:pad_al + tile] = x_ref[...].astype(compute_dtype)

        @pl.when(jnp.logical_and(t == 0, no == 0))
        def _seed():                                # causal pad: zeros | hid
            win_ref[:, base:pad_al] = jnp.broadcast_to(
                padcol_ref[...].astype(compute_dtype), (c, padding))

        acc = jnp.dot(w_ref[0], win_ref[:, base:base + tile],
                      preferred_element_type=f32)
        for j in range(1, k):                       # accumulating per-tap MXU dots
            off = base + j * dilation
            acc += jnp.dot(w_ref[j], win_ref[:, off:off + tile],
                           preferred_element_type=f32)
        o_ref[...] = (acc + b_ref[...]).astype(o_ref.dtype)

        @pl.when(no == pl.num_programs(2) - 1)
        def _carry():                               # context for the next time tile
            tail = win_ref[:, pad_al + tile - padding:pad_al + tile]
            win_ref[:, base:pad_al] = tail

    return kernel


def _make_pointwise_kernel(k, compute_dtype):
    """kernel_size == 1: plain channel-mixing matmul, no causal context."""
    f32 = jnp.float32

    def kernel(x_ref, w_ref, b_ref, o_ref):
        xb = x_ref[...].astype(compute_dtype)
        acc = jnp.dot(w_ref[0], xb, preferred_element_type=f32)
        for j in range(1, k):
            acc += jnp.dot(w_ref[j], xb, preferred_element_type=f32)
        o_ref[...] = (acc + b_ref[...]).astype(o_ref.dtype)

    return kernel


def _vmem_estimate(c, tile, tn_out, k, padding, pad_al, in_b, out_b, cd_b):
    lanes = lambda n: _round_up(max(int(n), 1), 128)
    subl = lambda n, p=1: _round_up(max(int(n), 1), 8 * p)
    pk = max(4 // cd_b, 1)
    b = 2 * subl(c) * lanes(tile) * in_b                     # x blocks (double-buffered)
    b += 2 * subl(tn_out) * lanes(tile) * out_b              # output blocks
    b += 2 * k * subl(tn_out, pk) * lanes(c) * cd_b          # weight blocks
    b += 2 * subl(tn_out) * lanes(1) * 4                     # bias blocks
    if padding > 0:
        b += 2 * subl(c) * lanes(1) * in_b                   # pad-column blocks
        b += subl(c, pk) * lanes(pad_al + tile) * cd_b       # staging-window scratch
    b += 2 * subl(c, pk) * lanes(tile) * cd_b                # in-kernel tap operands
    b += subl(tn_out) * lanes(tile) * 4                      # f32 accumulator
    return int(b)


def weight_share_conv1d(inp, hid, weight1, weight2, bias2, *,
                        input_dim, kernel_size, dilation,
                        time_tile=1024, n_out_tile=None,
                        compute_dtype=jnp.bfloat16, out_dtype=None,
                        x_buffer_count=None):
    """Equivalent of WeightShareConv1d.forward(input, dilation, hid).

    inp:     (B, input_dim + hidden_dim, L)   PyTorch NCW layout
    hid:     (B, hidden_dim, 1)               (only used when kernel_size > 1)
    weight1: (n_out, input_dim, kernel_size)
    weight2: (n_out, hidden_dim, kernel_size)
    bias2:   (n_out,)
    returns: (B, n_out, L)
    """
    B, c_total, L = inp.shape
    n_out = weight1.shape[0]
    k = kernel_size
    padding = (k - 1) * dilation
    pad_al = _round_up(padding, 128) if padding > 0 else 0
    out_dtype = inp.dtype if out_dtype is None else jnp.dtype(out_dtype)
    in_b = jnp.dtype(inp.dtype).itemsize
    out_b = jnp.dtype(out_dtype).itemsize
    cd_b = jnp.dtype(compute_dtype).itemsize

    # chip-aware VMEM budget: ~48 MiB on v7x (64 MiB VMEM), ~96 MiB on v5e/v6e.
    try:
        vmem_cap = int(pltpu.get_tpu_info().vmem_capacity_bytes)
    except Exception:
        vmem_cap = 64 * 2**20
    budget = min((vmem_cap * 3) // 4, 96 * 2**20)

    # n_out tiling bounds the f32 accumulator / output blocks for wide layers.
    if n_out_tile is None:
        tn_out = n_out if n_out <= 2048 else 512
    else:
        tn_out = max(1, min(int(n_out_tile), n_out))
    if tn_out < n_out:
        tn_out = _round_up(tn_out, 8)

    # time tiling: lane-dense multiples of 128; edge blocks are masked by Pallas.
    tile = L if L <= time_tile else max(128, (min(time_tile, L) // 128) * 128)

    def fits(tl, to):
        return _vmem_estimate(c_total, tl, to, k, padding, pad_al,
                              in_b, out_b, cd_b) <= budget

    while not fits(tile, tn_out):
        if tile > 128:
            tile = max(128, ((tile // 2) // 128) * 128)
        elif tn_out > 8:
            tn_out = max(8, _round_up(tn_out // 2, 8))
        else:
            break
    n_tiles = _cdiv(L, tile)
    n_out_tiles = _cdiv(n_out, tn_out)

    # small O(params) prep: per-tap fused weights (k, n_out, C) and bias column.
    w_cat = jnp.concatenate([weight1, weight2], axis=1)               # (n_out, C, k)
    w_taps = jnp.transpose(w_cat, (2, 0, 1)).astype(compute_dtype)    # (k, n_out, C)
    b2 = bias2.reshape(n_out, 1).astype(jnp.float32)

    x_kw = {}
    if x_buffer_count is not None and int(x_buffer_count) > 2:
        x_kw["pipeline_mode"] = pl.Buffered(int(x_buffer_count))
    x_spec = pl.BlockSpec((None, c_total, tile), lambda b, t, no: (b, 0, t), **x_kw)
    w_spec = pl.BlockSpec((k, tn_out, c_total), lambda b, t, no: (0, no, 0))
    b_spec = pl.BlockSpec((tn_out, 1), lambda b, t, no: (no, 0))
    o_spec = pl.BlockSpec((None, tn_out, tile), lambda b, t, no: (b, no, t))

    if padding > 0:
        # causal pad column: zeros for the x1 channels, `hid` for the z1 channels.
        padcol = jnp.concatenate(
            [jnp.zeros((B, input_dim, 1), inp.dtype), hid.astype(inp.dtype)], axis=1)
        kern = _make_causal_kernel(k, dilation, padding, pad_al, tile, compute_dtype)
        in_specs = [pl.BlockSpec((None, c_total, 1), lambda b, t, no: (b, 0, 0)),
                    x_spec, w_spec, b_spec]
        operands = (padcol, inp, w_taps, b2)
        scratch = [pltpu.VMEM((c_total, pad_al + tile), compute_dtype)]
        semantics = ("parallel", "arbitrary", "arbitrary")   # time carries the context
    else:
        kern = _make_pointwise_kernel(k, compute_dtype)
        in_specs = [x_spec, w_spec, b_spec]
        operands = (inp, w_taps, b2)
        scratch = []
        semantics = ("parallel", "parallel", "arbitrary")

    est = _vmem_estimate(c_total, tile, tn_out, k, padding, pad_al, in_b, out_b, cd_b)
    vmem_limit = int(min(max(est * 13 // 10, 16 * 2**20), budget))

    cost = pl.CostEstimate(
        flops=int(2 * B * n_out * L * k * c_total),
        transcendentals=0,
        bytes_accessed=int(B * c_total * L * in_b + B * n_out * L * out_b
                           + k * n_out * c_total * cd_b + n_out * 4))

    return pl.pallas_call(
        kern,
        out_shape=jax.ShapeDtypeStruct((B, n_out, L), out_dtype),
        grid_spec=pltpu.PrefetchScalarGridSpec(
            num_scalar_prefetch=0,
            grid=(B, n_tiles, n_out_tiles),
            in_specs=in_specs,
            out_specs=o_spec,
            scratch_shapes=scratch),
        compiler_params=pltpu.CompilerParams(
            dimension_semantics=semantics,
            vmem_limit_bytes=vmem_limit),
        cost_estimate=cost,
    )(*operands)


if __name__ == "__main__":
    def reference(inp, hid, weight1, weight2, bias2, *, input_dim, kernel_size,
                  dilation, compute_dtype=jnp.bfloat16):
        # pure-JAX reference: identical bf16 operand rounding, exact f32 conv.
        f32 = jnp.float32
        B = inp.shape[0]
        hidden_dim = inp.shape[1] - input_dim
        padding = (kernel_size - 1) * dilation
        x = jnp.pad(inp.astype(compute_dtype).astype(f32),
                    ((0, 0), (0, 0), (padding, 0)))
        x1 = x[:, :input_dim, :]
        z1 = x[:, input_dim:, :]
        if padding > 0:
            hid_c = hid.astype(compute_dtype).astype(f32)
            z1 = z1.at[:, :, :padding].set(
                jnp.broadcast_to(hid_c, (B, hidden_dim, padding)))
        w1 = weight1.astype(compute_dtype).astype(f32)
        w2 = weight2.astype(compute_dtype).astype(f32)
        dn = ("NCH", "OIH", "NCH")
        return (lax.conv_general_dilated(x1, w1, (1,), "VALID",
                                         rhs_dilation=(dilation,),
                                         dimension_numbers=dn,
                                         precision=lax.Precision.HIGHEST)
                + lax.conv_general_dilated(z1, w2, (1,), "VALID",
                                           rhs_dilation=(dilation,),
                                           dimension_numbers=dn,
                                           precision=lax.Precision.HIGHEST)
                + bias2.astype(f32)[None, :, None])

    def check(out, ref, name):
        assert out.shape == ref.shape, (name, out.shape, ref.shape)
        err = float(jnp.max(jnp.abs(out.astype(jnp.float32) - ref)))
        assert jnp.allclose(out.astype(jnp.float32), ref, atol=2e-4, rtol=2e-3), (name, err)

    key = jax.random.PRNGKey(0)
    keys = jax.random.split(key, 12)
    bound = 0.01
    B, input_dim, hidden_dim = 2, 4, 32
    C = input_dim + hidden_dim

    # case 1: kernel_size=2, dilation=1, short sequence (single time tile)
    n_out, k, dil = 16, 2, 1
    w1 = bound * jax.random.normal(keys[0], (n_out, input_dim, k), jnp.float32)
    w2 = bound * jax.random.normal(keys[1], (n_out, hidden_dim, k), jnp.float32)
    b2 = bound * jax.random.normal(keys[2], (n_out,), jnp.float32)
    L = 16
    inp = jax.random.normal(keys[3], (B, C, L), jnp.float32)
    hid = jax.random.normal(keys[4], (B, hidden_dim, 1), jnp.float32)
    out = jax.block_until_ready(weight_share_conv1d(
        inp, hid, w1, w2, b2, input_dim=input_dim, kernel_size=k, dilation=dil))
    check(out, reference(inp, hid, w1, w2, b2, input_dim=input_dim,
                         kernel_size=k, dilation=dil), "case1")

    # case 2: longer sequence, multi-tile time axis (carried context, masked tail)
    L2 = 300
    inp2 = jax.random.normal(keys[5], (B, C, L2), jnp.float32)
    hid2 = jax.random.normal(keys[6], (B, hidden_dim, 1), jnp.float32)
    out2 = jax.block_until_ready(weight_share_conv1d(
        inp2, hid2, w1, w2, b2, input_dim=input_dim, kernel_size=k, dilation=dil,
        time_tile=128))
    check(out2, reference(inp2, hid2, w1, w2, b2, input_dim=input_dim,
                          kernel_size=k, dilation=dil), "case2")

    # case 3: kernel_size=3, dilation=2, plus forced n_out tiling
    n_out3, k3, dil3 = 24, 3, 2
    w13 = bound * jax.random.normal(keys[7], (n_out3, input_dim, k3), jnp.float32)
    w23 = bound * jax.random.normal(keys[8], (n_out3, hidden_dim, k3), jnp.float32)
    b23 = bound * jax.random.normal(keys[9], (n_out3,), jnp.float32)
    inp3 = jax.random.normal(keys[10], (B, C, L2), jnp.float32)
    hid3 = jax.random.normal(keys[11], (B, hidden_dim, 1), jnp.float32)
    out3 = jax.block_until_ready(weight_share_conv1d(
        inp3, hid3, w13, w23, b23, input_dim=input_dim, kernel_size=k3,
        dilation=dil3, time_tile=128, n_out_tile=8))
    check(out3, reference(inp3, hid3, w13, w23, b23, input_dim=input_dim,
                          kernel_size=k3, dilation=dil3), "case3")

    print("KERNEL_OK")
</pallas_src>

<mosaic_0001>
module attributes {stable_mosaic.version = 11 : i64} {
  func.func @kernel(%arg0: i32, %arg1: i32, %arg2: i32, %arg3: memref<1x36x1xf32, #tpu.memory_space<vmem>>, %arg4: memref<1x36x16xf32, #tpu.memory_space<vmem>>, %arg5: memref<2x16x36xbf16, #tpu.memory_space<vmem>>, %arg6: memref<16x1xf32, #tpu.memory_space<vmem>>, %arg7: memref<1x16x16xf32, #tpu.memory_space<vmem>>, %arg8: memref<36x144xbf16, #tpu.memory_space<vmem>>) attributes {dimension_semantics = [#tpu.dimension_semantics<parallel>, #tpu.dimension_semantics<arbitrary>, #tpu.dimension_semantics<arbitrary>], iteration_bounds = array<i64: 2, 1, 1>, scalar_prefetch = 0 : i64, scratch_operands = 1 : i64, tpu.core_type = #tpu.core_type<tc>, window_params = [{transform_indices = @transform_0, window_bounds = array<i64: 1, 36, 1>}, {transform_indices = @transform_1, window_bounds = array<i64: 1, 36, 16>}, {transform_indices = @transform_2, window_bounds = array<i64: 2, 16, 36>}, {transform_indices = @transform_3, window_bounds = array<i64: 16, 1>}, {transform_indices = @transform_4, window_bounds = array<i64: 1, 16, 16>}]} {
    %c0_i32 = arith.constant 0 : i32
    %0 = arith.cmpi eq, %arg2, %c0_i32 : i32
    %1 = arith.extui %0 : i1 to i32
    %c0_i32_0 = arith.constant 0 : i32
    %2 = arith.cmpi ne, %1, %c0_i32_0 : i32
    scf.if %2 {
      %c0_18 = arith.constant 0 : index
      %c0_19 = arith.constant 0 : index
      %c0_20 = arith.constant 0 : index
      %26 = vector.load %arg4[%c0_18, %c0_19, %c0_20] : memref<1x36x16xf32, #tpu.memory_space<vmem>>, vector<1x36x16xf32>
      %27 = vector.shape_cast %26 : vector<1x36x16xf32> to vector<36x16xf32>
      %28 = arith.truncf %27 : vector<36x16xf32> to vector<36x16xbf16>
      %c0_21 = arith.constant 0 : index
      %c128_22 = arith.constant 128 : index
      %29 = vector.load %arg8[%c0_21, %c128_22] : memref<36x144xbf16, #tpu.memory_space<vmem>>, vector<36x16xbf16>
      tpu.vector_store %arg8[%c0_21, %c128_22], %28 {strides = array<i32>} : memref<36x144xbf16, #tpu.memory_space<vmem>>, vector<36x16xbf16>,
    } else {
    }
    %c0_i32_1 = arith.constant 0 : i32
    %3 = arith.cmpi eq, %arg1, %c0_i32_1 : i32
    %c0_i32_2 = arith.constant 0 : i32
    %4 = arith.cmpi eq, %arg2, %c0_i32_2 : i32
    %5 = arith.andi %3, %4 : i1
    %6 = arith.extui %5 : i1 to i32
    %c0_i32_3 = arith.constant 0 : i32
    %7 = arith.cmpi ne, %6, %c0_i32_3 : i32
    scf.if %7 {
      %c0_18 = arith.constant 0 : index
      %c0_19 = arith.constant 0 : index
      %c0_20 = arith.constant 0 : index
      %26 = vector.load %arg3[%c0_18, %c0_19, %c0_20] : memref<1x36x1xf32, #tpu.memory_space<vmem>>, vector<1x36x1xf32>
      %27 = vector.shape_cast %26 : vector<1x36x1xf32> to vector<36x1xf32>
      %28 = arith.truncf %27 : vector<36x1xf32> to vector<36x1xbf16>
      %c0_21 = arith.constant 0 : index
      %c127_22 = arith.constant 127 : index
      %29 = vector.load %arg8[%c0_21, %c127_22] : memref<36x144xbf16, #tpu.memory_space<vmem>>, vector<36x1xbf16>
      tpu.vector_store %arg8[%c0_21, %c127_22], %28 {strides = array<i32>} : memref<36x144xbf16, #tpu.memory_space<vmem>>, vector<36x1xbf16>,
    } else {
    }
    %c0 = arith.constant 0 : index
    %c0_4 = arith.constant 0 : index
    %c0_5 = arith.constant 0 : index
    %8 = vector.load %arg5[%c0, %c0_4, %c0_5] : memref<2x16x36xbf16, #tpu.memory_space<vmem>>, vector<1x16x36xbf16>
    %9 = vector.shape_cast %8 : vector<1x16x36xbf16> to vector<16x36xbf16>
    %c0_6 = arith.constant 0 : index
    %c127 = arith.constant 127 : index
    %10 = vector.load %arg8[%c0_6, %c127] : memref<36x144xbf16, #tpu.memory_space<vmem>>, vector<36x16xbf16>
    %cst = arith.constant dense<0.000000e+00> : vector<16x16xf32>
    %11 = tpu.matmul %9, %10, %cst {dimension_numbers = #tpu.dot_dimension_numbers<[1], [0], [0], [1], [0, 0, 1, 1], [], []>} : vector<16x36xbf16>, vector<36x16xbf16>, vector<16x16xf32> -> vector<16x16xf32>
    %c1 = arith.constant 1 : index
    %c0_7 = arith.constant 0 : index
    %c0_8 = arith.constant 0 : index
    %12 = vector.load %arg5[%c1, %c0_7, %c0_8] : memref<2x16x36xbf16, #tpu.memory_space<vmem>>, vector<1x16x36xbf16>
    %13 = vector.shape_cast %12 : vector<1x16x36xbf16> to vector<16x36xbf16>
    %c0_9 = arith.constant 0 : index
    %c128 = arith.constant 128 : index
    %14 = vector.load %arg8[%c0_9, %c128] : memref<36x144xbf16, #tpu.memory_space<vmem>>, vector<36x16xbf16>
    %cst_10 = arith.constant dense<0.000000e+00> : vector<16x16xf32>
    %15 = tpu.matmul %13, %14, %cst_10 {dimension_numbers = #tpu.dot_dimension_numbers<[1], [0], [0], [1], [0, 0, 1, 1], [], []>} : vector<16x36xbf16>, vector<36x16xbf16>, vector<16x16xf32> -> vector<16x16xf32>
    %16 = arith.addf %11, %15 : vector<16x16xf32>
    %c0_11 = arith.constant 0 : index
    %c0_12 = arith.constant 0 : index
    %17 = vector.load %arg6[%c0_11, %c0_12] : memref<16x1xf32, #tpu.memory_space<vmem>>, vector<16x1xf32>
    %18 = vector.broadcast %17 : vector<16x1xf32> to vector<16x16xf32>
    %19 = arith.addf %16, %18 : vector<16x16xf32>
    %c0_13 = arith.constant 0 : index
    %c0_14 = arith.constant 0 : index
    %c0_15 = arith.constant 0 : index
    %20 = vector.load %arg7[%c0_13, %c0_14, %c0_15] : memref<1x16x16xf32, #tpu.memory_space<vmem>>, vector<1x16x16xf32>
    %21 = vector.shape_cast %20 : vector<1x16x16xf32> to vector<16x16xf32>
    %22 = vector.shape_cast %19 : vector<16x16xf32> to vector<1x16x16xf32>
    tpu.vector_store %arg7[%c0_13, %c0_14, %c0_15], %22 {strides = array<i32>} : memref<1x16x16xf32, #tpu.memory_space<vmem>>, vector<1x16x16xf32>,
    %c0_i32_16 = arith.constant 0 : i32
    %23 = arith.cmpi eq, %arg2, %c0_i32_16 : i32
    %24 = arith.extui %23 : i1 to i32
    %c0_i32_17 = arith.constant 0 : i32
    %25 = arith.cmpi ne, %24, %c0_i32_17 : i32
    scf.if %25 {
      %c0_18 = arith.constant 0 : index
      %c143 = arith.constant 143 : index
      %26 = vector.load %arg8[%c0_18, %c143] : memref<36x144xbf16, #tpu.memory_space<vmem>>, vector<36x1xbf16>
      %c0_19 = arith.constant 0 : index
      %c127_20 = arith.constant 127 : index
      %27 = vector.load %arg8[%c0_19, %c127_20] : memref<36x144xbf16, #tpu.memory_space<vmem>>, vector<36x1xbf16>
      tpu.vector_store %arg8[%c0_19, %c127_20], %26 {strides = array<i32>} : memref<36x144xbf16, #tpu.memory_space<vmem>>, vector<36x1xbf16>,
    } else {
    }
    return
  }
  func.func @transform_0(%arg0: i32, %arg1: i32, %arg2: i32) -> (i32, i32, i32) {
    %c0_i32 = arith.constant 0 : i32
    %c0_i32_0 = arith.constant 0 : i32
    %c0_i32_1 = arith.constant 0 : i32
    return %arg0, %c0_i32, %c0_i32_0 : i32, i32, i32
  }
  func.func @transform_1(%arg0: i32, %arg1: i32, %arg2: i32) -> (i32, i32, i32) {
    %c0_i32 = arith.constant 0 : i32
    %c0_i32_0 = arith.constant 0 : i32
    return %arg0, %c0_i32, %arg1 : i32, i32, i32
  }
  func.func @transform_2(%arg0: i32, %arg1: i32, %arg2: i32) -> (i32, i32, i32) {
    %c0_i32 = arith.constant 0 : i32
    %c0_i32_0 = arith.constant 0 : i32
    %c0_i32_1 = arith.constant 0 : i32
    return %c0_i32, %arg2, %c0_i32_0 : i32, i32, i32
  }
  func.func @transform_3(%arg0: i32, %arg1: i32, %arg2: i32) -> (i32, i32) {
    %c0_i32 = arith.constant 0 : i32
    %c0_i32_0 = arith.constant 0 : i32
    return %arg2, %c0_i32 : i32, i32
  }
  func.func @transform_4(%arg0: i32, %arg1: i32, %arg2: i32) -> (i32, i32, i32) {
    %c0_i32 = arith.constant 0 : i32
    return %arg0, %arg2, %arg1 : i32, i32, i32
  }
}

</mosaic_0001>

<bundles_post_ra>
// kernel: tpu_custom_call.1
= control target key start
LH: loop header
LB: loop body
LE: loop exit
PB: predicated region body
PF: predicated region fallthrough
CT: control target
= control target key end

     0   :  { %9 = vsyncpa [#allocation4], 0  ;;  %s1176_s0 = inlined_call_operand.vmem [shape: f32[2,36,1], index: 0, kind: input, shape index: {}]   ;;  %s1177_s1 = inlined_call_operand.vmem [shape: f32[2,36,16], index: 1, kind: input, shape index: {}]   ;;  %s1178_s2 = inlined_call_operand.vmem [shape: bf16[2,16,36], index: 2, kind: input, shape index: {}]   ;;  %s1179_s3 = inlined_call_operand.vmem [shape: f32[16,1], index: 3, kind: input, shape index: {}]   ;;  %s1180_s4 = inlined_call_operand.hbm [shape: f32[2,16,16], index: 4, kind: output, shape index: {}]  }
   0x1   :  { %11 = vsyncpa [#allocation4 + $0x1], 0  ;;  %s1020_s15 = smov 0   ;;  %s1022_s16 = smov 0  }
   0x2   :  { %s1024_s17 = smov 0   ;;  %s1026_s18 = smov 0  }
   0x3   :  { %s1028_s19 = smov 0   ;;  %s1030_s20 = smov 0  }
   0x4 LB: > { %s750_s21 = sadd.s32 4294967295, %s984_s20   ;;  %s751_s22 = sadd.s32 4294967294, %s984_s20   ;;  %s984_s20 = sphi %s1030_s20, %s17_s20   ;;  %s980_s19 = sphi %s1028_s19, %s1187_s19   ;;  %s976_s18 = sphi %s1026_s18, %s1186_s18   ;;  %s972_s17 = sphi %s1024_s17, %s1185_s17   ;;  %s968_s16 = sphi %s1022_s16, %s1184_s16   ;;  %s964_s15 = sphi %s1020_s15, %s1183_s15  }
   0x5   : > { %s36_s23 = sadd.s32 1, %s980_s19  ;;  %s153_s24 = sadd.s32 1, %s972_s17 }
   0x6   : > { %p38_p0 = scmp.ge.s32.totalorder %s36_s23, 2  ;;  %p163_p1 = scmp.ne.s32.totalorder %s972_s17, %s968_s16 }
   0x7   : > { %p164_p2 = scmp.eq.s32.totalorder %s750_s21, 1  ;;  %p169_p3 = scmp.ne.s32.totalorder %s968_s16, %s964_s15 }
   0x8   : > { %s1189_s23 = smov (%p38_p0, %s36_s23), 0  ;;  %p170_p5 = scmp.eq.s32.totalorder %s751_s22, 1 }
   0x9   : > { %p1060_p4 = por %p164_p2, %p163_p1  ;;  %s146_s26 = ssub.s32 %s980_s19, %s1189_s23 }
   0xa   : > { %p756_p6 = scmp.ge.s32.totalorder %s984_s20, 1  ;;  %p151_p7 = scmp.eq.s32.totalorder %s146_s26, 0 }
   0xb   : > { %p1067_p8 = por %p170_p5, %p169_p3  ;;  %p225_p9 = scmp.lt.s32.totalorder %s984_s20, 3 }
   0xc   : > { %s1073_s28 = scalar_select %p151_p7, %s972_s17, %s153_s24  }
   0xd   : > { %p226_p10 = pnand %p756_p6, %p225_p9 }
   0xe   : > { %p269_p11 = scmp.lt.s32.totalorder (!%p226_p10), %s976_s18, 1  ;;  %s986_s11 = smov (!%p226_p10), 127  }
   0xf   : > { %229 = sbr.rel (%p226_p10) target bundleno = 498 (0x1f2), region = 36  ;;  %s989_s14 = smov (!%p226_p10), 1  }
  0x10   : > { %s266_s6 = sand.u32 (!%p226_p10), 1, %s968_s16  }
  0x14   : > { %s270_s29 = scalar_select %p269_p11, %s976_s18, 1  ;;  %vm326_vm0 = vcmask 125952   ;;  %vm331_vm1 = vcmask 123904   ;;  %vm420_vm2 = vcmask 1041408   ;;  %v987_v20 = vmov 0.0   ;;  %v906_v27 = vld [vmem:[%s1178_s2 + $0x8] sm:$0xff]  }
  0x15   : > { %809 = vmatprep.subr.bf16.mxu0 %v987_v20  ;;  %819 = vmatprep.subr.bf16.mxu1 %v987_v20  ;;  %vm379_vm3 = vcmask 1042424   ;;  %vm374_vm4 = vcmask 1044472   ;;  %vm988_vm5 = vmmov 0   ;;  %vm416_vm6 = vcmask 293888   ;;  %v556_v39 = vld [vmem:[%s1179_s3] sm:$0xff]  ;;  %v557_v40 = vld [vmem:[%s1179_s3 + $0x8] sm:$0xff] }
  0x16   : > { %s829_s30 = smul.u32 40, %s270_s29  ;;  %815 = vmatprep.mubr.msk.bf16.mxu0 %vm988_vm5, %v987_v20  ;;  %825 = vmatprep.mubr.msk.bf16.mxu1 %vm988_vm5, %v987_v20  ;;  %v990_v36 = vmov 0   ;;  %s991_s29 = smov 112   ;;  %vm503_vm7 = vcmask 7168   ;;  %v907_v56 = vld [vmem:[%s1178_s2] sm:$0xff]   ;;  %vm570_vm8 = vcmask 130048  }
  0x17   : > { %893 = vset.pattern.permute.xlu1 %v990_v36  ;;  %894 = vset.pattern.permute.xlu0 %v990_v36 }
  0x18   : > { %s273_s7 = scalar_lea.vmem %s1176_s0, %s829_s30  ;;  %s281_s10 = scalar_lea.vmem %s1177_s1, %s829_s30 }
  0x19   : > { %v300_v0 = vld [vmem:[%s281_s10] sm:$0xff]  ;;  %v301_v1 = vld [vmem:[%s281_s10 + $0x8] sm:$0xff]  ;;  %v302_v2 = vld [vmem:[%s281_s10 + $0x10] sm:$0xff] }
  0x1a   : > { %v303_v3 = vld [vmem:[%s281_s10 + $0x18] sm:$0xff]  ;;  %v304_v4 = vld [vmem:[%s281_s10 + $0x20] sm:$0xf]  ;;  %v790_v5 = vpack.c.bf16 %v300_v0, %v300_v0  ;;  %v791_v6 = vpack.c.bf16 %v301_v1, %v301_v1  ;;  %v792_v7 = vpack.c.bf16 %v302_v2, %v302_v2  ;;  %v340_v13 = vld [vmem:[%s273_s7 + $0x10] sm:$0xff]  ;;  %s800_s10 = sshll.u32 %s976_s18, 8  ;;  %s992_s18 = smov [#allocation3]  }
  0x1b   : > { %v342_v8 = vld [vmem:[%s273_s7 + $0x20] sm:$0xf]  ;;  %v793_v9 = vpack.c.bf16 %v303_v3, %v303_v3  ;;  %v794_v10 = vpack.c.bf16 %v304_v4, %v304_v4  ;;  %v341_v12 = vld [vmem:[%s273_s7 + $0x18] sm:$0xff]  ;;  %v797_v16 = vpack.c.bf16 %v340_v13, %v340_v13  ;;  %v339_v17 = vld [vmem:[%s273_s7 + $0x8] sm:$0xff]  ;;  %s1127_s13 = scalar_lea.hbm %s1180_s4, %s800_s10  ;;  %s912_s22 = sshll.u32 %s992_s18, 4  ;;  %s913_s22 = int_to_ptr.vmem [resolvable:$false] %s912_s22 }
  0x1c   : > { %v799_v11 = vpack.c.bf16 %v342_v8, %v342_v8  ;;  %327 = vst.msk [vmem:[#allocation2 + $0x4] sm:$0xf] %vm326_vm0, %v790_v5  ;;  %328 = vst.msk [vmem:[#allocation2 + $0xc] sm:$0xf] %vm326_vm0, %v791_v6  ;;  %v798_v14 = vpack.c.bf16 %v341_v12, %v341_v12  ;;  %v338_v15 = vld [vmem:[%s273_s7] sm:$0xff]  ;;  %v796_v19 = vpack.c.bf16 %v339_v17, %v339_v17  ;;  %s757_s7 = sshll.u32 %s266_s6, 4 }
  0x1d   : > { %329 = vst.msk [vmem:[#allocation2 + $0x14] sm:$0xf] %vm326_vm0, %v792_v7  ;;  %330 = vst.msk [vmem:[#allocation2 + $0x1c] sm:$0xf] %vm326_vm0, %v793_v9  ;;  %v795_v18 = vpack.c.bf16 %v338_v15, %v338_v15  ;;  %s268_s8 = scalar_lea.vmem [#allocation3], %s757_s7  ;;  %s914_s24 = scalar_lea.vmem %s913_s22, 512 }
  0x1e   : > { %332 = vst.msk [vmem:[#allocation2 + $0x24] sm:$0x3] %vm331_vm1, %v794_v10  ;;  %367 = vrot.lane.b32.xlu0 %v799_v11, %s986_s11  ;;  %365 = vrot.lane.b32.xlu1 %v798_v14, %s986_s11  ;;  %s625_s9 = sshll.u32 %s268_s8, 4  ;;  %s1129_s9 = int_to_ptr.vmem [resolvable:$true] %s625_s9 }
  0x1f   : > { %s908_s21 = scalar_lea.vmem %s1129_s9, 256  ;;  %p915_p1 = scmp.lt.s32.totalorder %s1129_s9, %s913_s22 }
  0x20   : > { %p909_p12 = scmp.ne.s32.totalorder %s1129_s9, %s908_s21  ;;  %p916_p2 = scmp.lt.s32.totalorder %s914_s24, %s908_s21 }
  0x22   : > { %363 = vrot.lane.b32.xlu0 %v797_v16, %s986_s11  ;;  %359 = vrot.lane.b32.xlu1 %v795_v18, %s986_s11  ;;  %p910_p13 = pnand %p909_p12, %p1060_p4  ;;  %p917_p3 = por %p916_p2, %p915_p1 }
  0x23   : > { %v905_v25 = vld [vmem:[#allocation2 + $0x4] ss:$8 sps:$4 sm:$0xff]  }
  0x24   : > { %v904_v23 = vld [vmem:[#allocation2 + $0x14] ss:$8 sps:$4 sm:$0xff]   ;;  %v900_v37 = vld [vmem:[#allocation2 + $0x4] ss:$8 sps:$4 sm:$0xff]   ;;  %p911_p0 = pneg %p910_p13 }
  0x25   : > { %v903_v21 = vld [vmem:[#allocation2 + $0x24] ss:$0 sps:$4 sm:$0x33]   ;;  %v897_v34 = vld [vmem:[#allocation2 + $0x14] ss:$8 sps:$4 sm:$0xff]  }
  0x26   : > { %361 = vrot.lane.b32.xlu0 %v796_v19, %s986_s11  ;;  %v422_v22 = vsel %vm420_vm2, %v903_v21, 0  ;;  %v576_v41 = vld [vmem:[#allocation2 + $0x4] sm:$0xf]  ;;  %v578_v42 = vld [vmem:[#allocation2 + $0x14] sm:$0xf]  ;;  %p918_p5 = pnand %p917_p3, %p911_p0 }
  0x27   : > { %810 = vmatpush3.bf16.msra.mxu0 %v422_v22  ;;  %v577_v43 = vld [vmem:[#allocation2 + $0xc] sm:$0xf]  ;;  %v580_v44 = vld [vmem:[#allocation2 + $0x24] sm:$0x3]  ;;  %v579_v45 = vld [vmem:[#allocation2 + $0x1c] sm:$0xf] }
  0x28   : > { %811 = vmatprep.subr.bf16.mxu0 %v987_v20 }
  0x2b   : > { %812 = vmatpush3.bf16.msra.mxu0 %v904_v23 }
  0x2c   : > { %813 = vmatprep.subr.bf16.mxu0 %v987_v20 }
  0x2f   : > { %814 = vmatpush3.bf16.msra.mxu0 %v905_v25 }
  0x32   : > { %816 = vmatmul.mubr.msk.bf16.vlgmr.msra.gmra.mxu0 %vm416_vm6, %v906_v27 }
  0x90   : > { %v368_v24 = vpop.permute.xlu0 %367  ;;  %v366_v26 = vpop.permute.xlu1 %365 }
  0x91   : > { %380 = vst.msk [vmem:[#allocation2 + $0x20] sm:$0x3] %vm379_vm3, %v368_v24 }
  0x92   : > { %378 = vst.msk [vmem:[#allocation2 + $0x18] sm:$0xf] %vm374_vm4, %v366_v26 }
  0x94   : > { %v364_v28 = vpop.permute.xlu0 %363  ;;  %v360_v29 = vpop.permute.xlu1 %359 }
  0x95   : > { %377 = vst.msk [vmem:[#allocation2 + $0x10] sm:$0xf] %vm374_vm4, %v364_v28  ;;  %375 = vst.msk [vmem:[#allocation2] sm:$0xf] %vm374_vm4, %v360_v29 }
  0x98   : > { %v362_v30 = vpop.permute.xlu0 %361  ;;  %v387_v31 = vld [vmem:[#allocation2 + $0x20] sm:$0x33] }
  0x99   : > { %376 = vst.msk [vmem:[#allocation2 + $0x8] sm:$0xf] %vm374_vm4, %v362_v30  ;;  %v783_v32 = vcombine.high %v387_v31, %v387_v31  ;;  %v782_v33 = vcombine.low %v387_v31, %v387_v31 }
  0x9b   : > { %501 = vrot.lane.b32.xlu0 %v783_v32, %s989_s14  ;;  %499 = vrot.lane.b32.xlu1 %v782_v33, %s989_s14 }
  0x9c   : > { %v899_v35 = vld [vmem:[#allocation2 + $0x10] ss:$8 sps:$4 sm:$0xff]  }
  0x9f   : > { %497 = vrot.lane.b32.xlu0 %v897_v34, %s989_s14  ;;  %495 = vrot.lane.b32.xlu1 %v899_v35, %s989_s14 }
  0xa0   : > { %v902_v38 = vld [vmem:[#allocation2] ss:$8 sps:$4 sm:$0xff]  }
  0xa3   : > { %493 = vrot.lane.b32.xlu0 %v900_v37, %s989_s14  ;;  %491 = vrot.lane.b32.xlu1 %v902_v38, %s989_s14  ;;  %s1131_s14 = scalar_lea.sflag [#allocation4], %s266_s6 }
  0xa7   : > { %560 = vperm.xlu1 %893, %v556_v39   ;;  %565 = vperm.xlu0 %894, %v557_v40  }
  0xab   : > { %586 = vrot.lane.b32.xlu1 %v576_v41, %s991_s29  ;;  %590 = vrot.lane.b32.xlu0 %v578_v42, %s991_s29 }
  0xaf   : > { %588 = vrot.lane.b32.xlu1 %v577_v43, %s991_s29  ;;  %594 = vrot.lane.b32.xlu0 %v580_v44, %s991_s29 }
  0xb3   : > { %592 = vrot.lane.b32.xlu1 %v579_v45, %s991_s29 }
  0xf2   : > { %v458_v57 = vpop.f32.mrf.mxu0 }
  0xf4   : > { %v817_v59 = vpop.f32.mrf.mxu0 }
  0xf6   : > { %v461_v60 = vpop.f32.mrf.mxu0 }
  0xf8   : > { %v818_v61 = vpop.f32.mrf.mxu0 }
 0x10d   : > { %v502_v46 = vpop.permute.xlu0 %501  ;;  %v500_v47 = vpop.permute.xlu1 %499 }
 0x10e   : > { %v506_v48 = vsel %vm503_vm7, %v500_v47, %v502_v46 }
 0x10f   : > { %v513_v49 = vsel %vm420_vm2, %v506_v48, 0 }
 0x110   : > { %820 = vmatpush3.bf16.msra.mxu1 %v513_v49 }
 0x111   : > { %v498_v50 = vpop.permute.xlu0 %497  ;;  %v496_v51 = vpop.permute.xlu1 %495  ;;  %821 = vmatprep.subr.bf16.mxu1 %v987_v20 }
 0x112   : > { %v505_v52 = vsel %vm503_vm7, %v496_v51, %v498_v50 }
 0x114   : > { %822 = vmatpush3.bf16.msra.mxu1 %v505_v52 }
 0x115   : > { %v494_v53 = vpop.permute.xlu0 %493  ;;  %v492_v54 = vpop.permute.xlu1 %491  ;;  %823 = vmatprep.subr.bf16.mxu1 %v987_v20 }
 0x116   : > { %v504_v55 = vsel %vm503_vm7, %v492_v54, %v494_v53 }
 0x118   : > { %824 = vmatpush3.bf16.msra.mxu1 %v504_v55 }
 0x11b   : > { %826 = vmatmul.mubr.msk.bf16.vlgmr.msra.gmra.mxu1 %vm416_vm6, %v907_v56 }
 0x122   : > { %v561_v58 = vpop.permute.xlu1 %560  ;;  %v566_v62 = vpop.permute.xlu0 %565 }
 0x126   : > { %v587_v63 = vpop.permute.xlu1 %586  ;;  %v591_v0 = vpop.permute.xlu0 %590 }
 0x127   : > { %602 = vst.msk [vmem:[#allocation2] sm:$0xf] %vm374_vm4, %v587_v63  ;;  %604 = vst.msk [vmem:[#allocation2 + $0x10] sm:$0xf] %vm374_vm4, %v591_v0 }
 0x12a   : > { %v589_v1 = vpop.permute.xlu1 %588  ;;  %v595_v2 = vpop.permute.xlu0 %594 }
 0x12b   : > { %603 = vst.msk [vmem:[#allocation2 + $0x8] sm:$0xf] %vm374_vm4, %v589_v1 }
 0x12c   : > { %607 = vst.msk [vmem:[#allocation2 + $0x20] sm:$0x3] %vm379_vm3, %v595_v2 }
 0x12e   : > { %v593_v3 = vpop.permute.xlu1 %592 }
 0x12f   : > { %605 = vst.msk [vmem:[#allocation2 + $0x18] sm:$0xf] %vm374_vm4, %v593_v3 }
 0x1db   : > { %v549_v4 = vpop.f32.mrf.mxu1 }
 0x1dc   : > { %v550_v5 = vadd.f32 %v549_v4, %v458_v57 }
 0x1dd   : > { %v827_v6 = vpop.f32.mrf.mxu1 }
 0x1de   : > { %v568_v7 = vadd.f32 %v561_v58, %v550_v5 }
 0x1df   : > { %v552_v8 = vpop.f32.mrf.mxu1 }
 0x1e0   : > { %571 = vst.msk [vmem:[%s268_s8] sm:$0xff] %vm570_vm8, %v568_v7  ;;  %v553_v9 = vadd.f32 %v552_v8, %v461_v60 }
 0x1e1   : > { %v828_v10 = vpop.f32.mrf.mxu1 }
 0x1e2   : > { %v569_v11 = vadd.f32 %v566_v62, %v553_v9 }
 0x1e4   : > { %572 = vst.msk [vmem:[%s268_s8 + $0x8] sm:$0xff] %vm570_vm8, %v569_v11 }
 0x1e5   : > { %921 = shalt.err (!%p918_p5)
}
 0x1e6   : > { %s922_s26 = scalar_lea.hbm %s1127_s13, 256  ;;  %s926_s5 = scalar_lea.hbm %s1180_s4, 512 }
 0x1e7   : > { %p923_p6 = scmp.ne.s32.totalorder %s1127_s13, %s922_s26  ;;  %p927_p10 = scmp.lt.s32.totalorder %s1127_s13, %s1180_s4 }
 0x1e8   : > { %p928_p11 = scmp.lt.s32.totalorder %s926_s5, %s922_s26 }
 0x1e9   : > { %p924_p7 = pnand %p923_p6, %p1060_p4 }
 0x1ea   : > { %p929_p12 = por %p928_p11, %p927_p10 }
 0x1eb   : > { %p925_p9 = pneg %p924_p7 }
 0x1ed   : > { %p930_p13 = pnand %p929_p12, %p925_p9 }
 0x1ef   : > { %933 = shalt.err (!%p930_p13)
}
 0x1f0   : > { %s993_s8 = smov 128   ;;  %s994_s10 = smov 8  }
 0x1f1   : > { %830 = dma.vmem_to_hbm [thread:$0]  (%p1060_p4), %s1129_s9, 256, %s1127_s13, %s1131_s14, %s993_s8, %s993_s8, %s994_s10  }
 0x1f2 PF: > { %p836_p0 = scmp.ge.s32.totalorder %s984_s20, 2  ;;  %s640_s11 = sand.u32 1, %s964_s15  }
 0x1f3   : > { %s641_s12 = scalar_lea.sflag [#allocation4], %s640_s11 }
 0x1f4   : > { %p833_p1 = pnand %p836_p0, %p1067_p8 }
 0x1f6   : > { %p834_p2 = pneg %p833_p1 }
 0x1f8   : > { %959 = dma.done.wait (%p834_p2), %s641_s12, 256  }
 0x1f9   : > { %961 = vsyncadd (%p834_p2), %s641_s12, 4294967040  ;;  %s17_s20 = sadd.s32 1, %s984_s20   ;;  %s1183_s15 = smov %s968_s16 }
 0x1fa   : > { %p14_p3 = scmp.ge.s32.totalorder %s17_s20, 4   ;;  %s1184_s16 = smov %s972_s17 }
 0x1fb   : > { %s1185_s17 = smov %s1073_s28  ;;  %s1186_s18 = smov %s980_s19 }
 0x1fc   : > { %s1187_s19 = smov %s1189_s23  ;;  %16 = sbr.rel (!%p14_p3) target bundleno = 4 (0x4), region = 93 }
 0x201   :  { %646 = vsyncpa [#allocation4], 1 }
 0x202   :  { %648 = vsyncpa [#allocation4 + $0x1], 1 }

</bundles_post_ra>
